<compile_context>
chip_gen: v7x
topology: tpu7x:2x2x1
jax: 0.10.0
libtpu: 0.0.40
codegen_flags: <defaults>
</compile_context>

<pallas_src>
import jax
import jax.numpy as jnp
from jax.experimental import pallas as pl
from jax.experimental.pallas import tpu as pltpu


def _round_up(n, m):
    return ((n + m - 1) // m) * m


def _pad2(a, rows, cols):
    r, c = a.shape
    if r == rows and c == cols:
        return a
    return jnp.pad(a, ((0, rows - r), (0, cols - c)))


def _make_mlp_kernel(num_hidden):
    def kernel(*refs):
        x_ref = refs[0]
        hidden_refs = refs[1:1 + 2 * num_hidden]
        wo_ref = refs[1 + 2 * num_hidden]
        bo_ref = refs[2 + 2 * num_hidden]      # SMEM scalar
        out_ref = refs[3 + 2 * num_hidden]

        h = x_ref[...]                                   # (TB, Dp) bf16
        for l in range(num_hidden):
            w_ref = hidden_refs[2 * l]
            b_ref = hidden_refs[2 * l + 1]
            # MXU matmul: bf16 inputs, f32 accumulation.
            h = jnp.dot(h.astype(jnp.bfloat16), w_ref[...],
                        preferred_element_type=jnp.float32)
            # bias + ReLU in f32 on the VPU.  Dropout = identity at inference.
            h = jnp.maximum(h + b_ref[...], 0.0)

        # Output head Linear(Hp, 1) on VPU/XLU (avoid a wasteful N=1 MXU matmul).
        # Fused chunked MAC over 128-lane slices: never materializes a (TB, Hp) f32 temp.
        hp = h.shape[-1]
        part = h[:, 0:128] * wo_ref[:, 0:128]            # (TB, 128) f32
        for j in range(1, hp // 128):
            part = part + h[:, j * 128:(j + 1) * 128] * wo_ref[:, j * 128:(j + 1) * 128]
        # XLU transpose + sublane reduction -> lane-dense (1, TB) row (batch on lanes).
        o_row = jnp.sum(part.T, axis=0, keepdims=True)   # (1, TB)
        out_ref[...] = (o_row + bo_ref[0]).astype(out_ref.dtype)

    return kernel


def mlp_forward(x, params, *, block_batch=512, feature_pad=128):
    """Inference forward of MLP(input_dim, hidden_dims).

    params: [(w1, b1), ..., (wn, bn), (wo, bo)] with w stored [in_dim, out_dim]
    (y = x @ w + b, equivalent to PyTorch's y = x @ W_torch.T + b).
    """
    assert block_batch % 128 == 0, "block_batch must be a multiple of 128 (lane width)"
    assert feature_pad % 128 == 0
    batch, d = x.shape
    hidden_params, (wo, bo) = params[:-1], params[-1]
    num_hidden = len(hidden_params)

    # Batch tile: multiples of 128 keep every block (8,128)-aligned and output stores dense.
    # Ensure >= 2 grid steps when batch allows, so "parallel" can use both v7x TensorCores.
    bp128 = _round_up(batch, 128)
    if bp128 >= 256:
        tb = min(block_batch, _round_up(bp128 // 2, 128))
    else:
        tb = min(block_batch, bp128)
    batch_p = _round_up(batch, tb)
    grid = (batch_p // tb,)

    # Feature padding to the lane width; bf16 for MXU-native inputs / half the HBM bytes.
    dp = _round_up(d, feature_pad)
    x_p = _pad2(x, batch_p, dp).astype(jnp.bfloat16)

    operands = [x_p]
    in_specs = [pl.BlockSpec((tb, dp), lambda i: (i, 0))]
    flops = 0
    resident_bytes = 0
    prev_p = dp
    max_hp = dp
    for (w, b) in hidden_params:
        hp = _round_up(w.shape[1], feature_pad)
        w_p = _pad2(w, prev_p, hp).astype(jnp.bfloat16)
        b_p = _pad2(b.reshape(1, -1), 1, hp).astype(jnp.float32)
        operands += [w_p, b_p]
        # Constant block index + Buffered(1): weights stay VMEM-resident, single-buffered.
        in_specs += [
            pl.BlockSpec((prev_p, hp), lambda i: (0, 0), pipeline_mode=pl.Buffered(1)),
            pl.BlockSpec((1, hp), lambda i: (0, 0), pipeline_mode=pl.Buffered(1)),
        ]
        flops += 2 * batch_p * prev_p * hp
        resident_bytes += int(w_p.size) * 2 + int(b_p.size) * 4
        prev_p = hp
        max_hp = max(max_hp, hp)

    wo_row = _pad2(wo, prev_p, 1).astype(jnp.float32).T        # (1, Hp) row for the VPU head
    bo_s = jnp.asarray(bo, jnp.float32).reshape(1)             # scalar output bias -> SMEM
    operands += [wo_row, bo_s]
    in_specs += [
        pl.BlockSpec((1, prev_p), lambda i: (0, 0), pipeline_mode=pl.Buffered(1)),
        pl.BlockSpec(memory_space=pltpu.MemorySpace.SMEM),
    ]
    flops += 2 * batch_p * prev_p
    resident_bytes += int(wo_row.size) * 4 + 4

    # Explicit VMEM budget: resident weights + double-buffered x/out blocks + f32/bf16
    # intermediates + headroom, clamped to physical VMEM (64 MiB/TC on v7x, 128 MiB v5e/v6e).
    stream_bytes = 2 * (tb * dp * 2) + 2 * (tb * 4)
    interm_bytes = tb * max_hp * (4 + 2) + tb * max_hp * 4
    needed = resident_bytes + stream_bytes + interm_bytes
    try:
        phys_vmem = int(pltpu.get_tpu_info().vmem_capacity_bytes)
    except Exception:
        phys_vmem = 64 * 1024 * 1024
    vmem_limit = int(min(max(needed * 5 // 4 + (2 << 20), 32 << 20), phys_vmem - (4 << 20)))

    bytes_accessed = sum(int(op.size) * op.dtype.itemsize for op in operands) + batch_p * 4

    out = pl.pallas_call(
        _make_mlp_kernel(num_hidden),
        grid=grid,
        out_shape=jax.ShapeDtypeStruct((1, batch_p), jnp.float32),   # lane-dense output slab
        in_specs=in_specs,
        out_specs=pl.BlockSpec((1, tb), lambda i: (0, i)),
        compiler_params=pltpu.CompilerParams(
            dimension_semantics=("parallel",),
            vmem_limit_bytes=vmem_limit),
        cost_estimate=pl.CostEstimate(flops=int(flops), transcendentals=0,
                                      bytes_accessed=int(bytes_accessed)),
    )(*operands)

    # .squeeze() of the PyTorch module + drop batch padding (glue, outside the kernel).
    return out[0, :batch]


def init_params(key, input_dim, hidden_dims):
    """Deterministic PyTorch-Linear-style init. Weights stored as [in_dim, out_dim]."""
    params = []
    prev = input_dim
    for i, h in enumerate(list(hidden_dims) + [1]):
        kw, kb = jax.random.split(jax.random.fold_in(key, i))
        bound = 1.0 / (prev ** 0.5)
        w = jax.random.uniform(kw, (prev, h), jnp.float32, -bound, bound)
        b = jax.random.uniform(kb, (h,), jnp.float32, -bound, bound)
        params.append((w, b))
        prev = h
    return params


if __name__ == "__main__":
    key = jax.random.PRNGKey(0)
    batch, input_dim = 200, 16          # small, but batch > tile -> exercises the grid + tail pad
    hidden_dims = [32, 32]

    kx, kp = jax.random.split(key)
    x = jax.random.normal(kx, (batch, input_dim), jnp.float32)
    params = init_params(kp, input_dim, hidden_dims)

    # block_batch=128 -> grid of 2 batch tiles (also exercises the 2-step megacore split).
    y = mlp_forward(x, params, block_batch=128)
    jax.block_until_ready(y)

    # pure-JAX reference (same bf16 rounding of x / hidden weights, f32 accumulation)
    def ref(x, params):
        h = x.astype(jnp.bfloat16).astype(jnp.float32)
        for w, b in params[:-1]:
            wq = w.astype(jnp.bfloat16).astype(jnp.float32)
            h = jnp.maximum(h @ wq + b.reshape(1, -1), 0.0)
        wo, bo = params[-1]
        return jnp.squeeze(h @ wo + bo.reshape(1, -1), axis=-1)

    y_ref = ref(x, params)
    assert y.shape == (batch,)
    assert jnp.allclose(y, y_ref, atol=1e-3, rtol=1e-3), float(jnp.max(jnp.abs(y - y_ref)))
    print("KERNEL_OK")
</pallas_src>

<mosaic_0001>
module attributes {stable_mosaic.version = 11 : i64} {
  func.func @kernel(%arg0: i32, %arg1: memref<128x128xbf16, #tpu.memory_space<vmem>>, %arg2: memref<128x128xbf16, #tpu.memory_space<vmem>>, %arg3: memref<1x128xf32, #tpu.memory_space<vmem>>, %arg4: memref<128x128xbf16, #tpu.memory_space<vmem>>, %arg5: memref<1x128xf32, #tpu.memory_space<vmem>>, %arg6: memref<1x128xf32, #tpu.memory_space<vmem>>, %arg7: memref<1xf32, #tpu.memory_space<smem>>, %arg8: memref<1x128xf32, #tpu.memory_space<vmem>>) attributes {dimension_semantics = [#tpu.dimension_semantics<parallel>], iteration_bounds = array<i64: 2>, scalar_prefetch = 0 : i64, scratch_operands = 0 : i64, tpu.core_type = #tpu.core_type<tc>, window_params = [{transform_indices = @transform_0, window_bounds = array<i64: 128, 128>}, {pipeline_mode = #tpu.pipeline_mode<synchronous>, transform_indices = @transform_1, window_bounds = array<i64: 128, 128>}, {pipeline_mode = #tpu.pipeline_mode<synchronous>, transform_indices = @transform_2, window_bounds = array<i64: 1, 128>}, {pipeline_mode = #tpu.pipeline_mode<synchronous>, transform_indices = @transform_3, window_bounds = array<i64: 128, 128>}, {pipeline_mode = #tpu.pipeline_mode<synchronous>, transform_indices = @transform_4, window_bounds = array<i64: 1, 128>}, {pipeline_mode = #tpu.pipeline_mode<synchronous>, transform_indices = @transform_5, window_bounds = array<i64: 1, 128>}, {transform_indices = @transform_6, window_bounds = array<i64: 1>}, {transform_indices = @transform_7, window_bounds = array<i64: 1, 128>}]} {
    %c0 = arith.constant 0 : index
    %c0_0 = arith.constant 0 : index
    %0 = vector.load %arg1[%c0, %c0_0] : memref<128x128xbf16, #tpu.memory_space<vmem>>, vector<128x128xbf16>
    %c0_1 = arith.constant 0 : index
    %c0_2 = arith.constant 0 : index
    %1 = vector.load %arg2[%c0_1, %c0_2] : memref<128x128xbf16, #tpu.memory_space<vmem>>, vector<128x128xbf16>
    %cst = arith.constant dense<0.000000e+00> : vector<128x128xf32>
    %2 = tpu.matmul %0, %1, %cst {dimension_numbers = #tpu.dot_dimension_numbers<[1], [0], [0], [1], [0, 0, 1, 1], [], []>} : vector<128x128xbf16>, vector<128x128xbf16>, vector<128x128xf32> -> vector<128x128xf32>
    %c0_3 = arith.constant 0 : index
    %c0_4 = arith.constant 0 : index
    %3 = vector.load %arg3[%c0_3, %c0_4] : memref<1x128xf32, #tpu.memory_space<vmem>>, vector<1x128xf32>
    %4 = vector.broadcast %3 : vector<1x128xf32> to vector<128x128xf32>
    %5 = arith.addf %2, %4 : vector<128x128xf32>
    %cst_5 = arith.constant 0.000000e+00 : f32
    %6 = vector.broadcast %cst_5 : f32 to vector<128x128xf32>
    %7 = arith.maximumf %5, %6 : vector<128x128xf32>
    %8 = arith.truncf %7 : vector<128x128xf32> to vector<128x128xbf16>
    %c0_6 = arith.constant 0 : index
    %c0_7 = arith.constant 0 : index
    %9 = vector.load %arg4[%c0_6, %c0_7] : memref<128x128xbf16, #tpu.memory_space<vmem>>, vector<128x128xbf16>
    %cst_8 = arith.constant dense<0.000000e+00> : vector<128x128xf32>
    %10 = tpu.matmul %8, %9, %cst_8 {dimension_numbers = #tpu.dot_dimension_numbers<[1], [0], [0], [1], [0, 0, 1, 1], [], []>} : vector<128x128xbf16>, vector<128x128xbf16>, vector<128x128xf32> -> vector<128x128xf32>
    %c0_9 = arith.constant 0 : index
    %c0_10 = arith.constant 0 : index
    %11 = vector.load %arg5[%c0_9, %c0_10] : memref<1x128xf32, #tpu.memory_space<vmem>>, vector<1x128xf32>
    %12 = vector.broadcast %11 : vector<1x128xf32> to vector<128x128xf32>
    %13 = arith.addf %10, %12 : vector<128x128xf32>
    %cst_11 = arith.constant 0.000000e+00 : f32
    %14 = vector.broadcast %cst_11 : f32 to vector<128x128xf32>
    %15 = arith.maximumf %13, %14 : vector<128x128xf32>
    %c0_12 = arith.constant 0 : index
    %c0_13 = arith.constant 0 : index
    %16 = vector.load %arg6[%c0_12, %c0_13] : memref<1x128xf32, #tpu.memory_space<vmem>>, vector<1x128xf32>
    %17 = vector.broadcast %16 : vector<1x128xf32> to vector<128x128xf32>
    %18 = arith.mulf %15, %17 : vector<128x128xf32>
    %19 = tpu.transpose %18, [1, 0] : vector<128x128xf32> -> vector<128x128xf32>
    %cst_14 = arith.constant dense<0.000000e+00> : vector<128xf32>
    %20 = vector.multi_reduction <add>, %19, %cst_14 [0] : vector<128x128xf32> to vector<128xf32>
    %21 = vector.shape_cast %20 : vector<128xf32> to vector<1x128xf32>
    %c0_15 = arith.constant 0 : index
    %22 = memref.load %arg7[%c0_15] : memref<1xf32, #tpu.memory_space<smem>>
    %23 = vector.broadcast %22 : f32 to vector<1x128xf32>
    %24 = arith.addf %21, %23 : vector<1x128xf32>
    %c0_16 = arith.constant 0 : index
    %c0_17 = arith.constant 0 : index
    %25 = vector.load %arg8[%c0_16, %c0_17] : memref<1x128xf32, #tpu.memory_space<vmem>>, vector<1x128xf32>
    tpu.vector_store %arg8[%c0_16, %c0_17], %24 {strides = array<i32>} : memref<1x128xf32, #tpu.memory_space<vmem>>, vector<1x128xf32>,
    return
  }
  func.func @transform_0(%arg0: i32) -> (i32, i32) {
    %c0_i32 = arith.constant 0 : i32
    %c0_i32_0 = arith.constant 0 : i32
    return %arg0, %c0_i32 : i32, i32
  }
  func.func @transform_1(%arg0: i32) -> (i32, i32) {
    %c0_i32 = arith.constant 0 : i32
    %c0_i32_0 = arith.constant 0 : i32
    %c0_i32_1 = arith.constant 0 : i32
    return %c0_i32, %c0_i32_0 : i32, i32
  }
  func.func @transform_2(%arg0: i32) -> (i32, i32) {
    %c0_i32 = arith.constant 0 : i32
    %c0_i32_0 = arith.constant 0 : i32
    %c0_i32_1 = arith.constant 0 : i32
    return %c0_i32, %c0_i32_0 : i32, i32
  }
  func.func @transform_3(%arg0: i32) -> (i32, i32) {
    %c0_i32 = arith.constant 0 : i32
    %c0_i32_0 = arith.constant 0 : i32
    %c0_i32_1 = arith.constant 0 : i32
    return %c0_i32, %c0_i32_0 : i32, i32
  }
  func.func @transform_4(%arg0: i32) -> (i32, i32) {
    %c0_i32 = arith.constant 0 : i32
    %c0_i32_0 = arith.constant 0 : i32
    %c0_i32_1 = arith.constant 0 : i32
    return %c0_i32, %c0_i32_0 : i32, i32
  }
  func.func @transform_5(%arg0: i32) -> (i32, i32) {
    %c0_i32 = arith.constant 0 : i32
    %c0_i32_0 = arith.constant 0 : i32
    %c0_i32_1 = arith.constant 0 : i32
    return %c0_i32, %c0_i32_0 : i32, i32
  }
  func.func @transform_6(%arg0: i32) -> i32 {
    %c0_i32 = arith.constant 0 : i32
    %c0_i32_0 = arith.constant 0 : i32
    return %c0_i32 : i32
  }
  func.func @transform_7(%arg0: i32) -> (i32, i32) {
    %c0_i32 = arith.constant 0 : i32
    %c0_i32_0 = arith.constant 0 : i32
    return %c0_i32, %arg0 : i32, i32
  }
}

</mosaic_0001>

<bundles_post_ra>
// kernel: tpu_custom_call.1
= control target key start
LH: loop header
LB: loop body
LE: loop exit
PB: predicated region body
PF: predicated region fallthrough
CT: control target
= control target key end

     0   :  { %s1682_s0 = inlined_call_operand.hbm [shape: bf16[256,128], index: 0, kind: input, shape index: {}]   ;;  %s1683_s1 = inlined_call_operand.hbm [shape: bf16[128,128], index: 1, kind: input, shape index: {}]   ;;  %s1684_s2 = inlined_call_operand.vmem [shape: f32[1,128], index: 2, kind: input, shape index: {}]   ;;  %s1685_s3 = inlined_call_operand.hbm [shape: bf16[128,128], index: 3, kind: input, shape index: {}]   ;;  %s1686_s4 = inlined_call_operand.vmem [shape: f32[1,128], index: 4, kind: input, shape index: {}]   ;;  %s1687_s5 = inlined_call_operand.vmem [shape: f32[1,128], index: 5, kind: input, shape index: {}]   ;;  %s1688_s6 = inlined_call_operand.<no memory space> [shape: f32[1], index: 6, kind: input, shape index: {}]   ;;  %s1689_s7 = inlined_call_operand.hbm [shape: f32[1,256], index: 7, kind: output, shape index: {}]  }
   0x1   :  { %12 = sst [smem:[#allocation2]] %s1688_s6 }
   0x2   :  { %13 = vsyncpa [#allocation4], 0 }
   0x3   :  { %15 = vsyncpa [#allocation4 + $0x1], 0 }
   0x4   :  { %16 = vsyncpa [#allocation7], 0 }
   0x5   :  { %17 = vsyncpa [#allocation5], 0 }
   0x6   :  { %19 = vsyncpa [#allocation5 + $0x1], 0  ;;  %s1385_s26 = smov 0   ;;  %s1387_s27 = smov 0  }
   0x7   :  { %s1389_s28 = smov 0   ;;  %s1391_s29 = smov 0  }
   0x8 LB: > { %s1406_s6 = sadd.s32 4294967295, %s1334_s29   ;;  %s946_s30 = sadd.s32 4294967294, %s1334_s29   ;;  %s1334_s29 = sphi %s1391_s29, %s1709_s29   ;;  %s1330_s28 = sphi %s1389_s28, %s1708_s28   ;;  %s1326_s27 = sphi %s1387_s27, %s1707_s27   ;;  %s1322_s26 = sphi %s1385_s26, %s1706_s26  }
   0x9   : > { %p45_p0 = scmp.ne.s32.totalorder %s1326_s27, %s1322_s26  ;;  %p1690_p1 = scmp.eq.s32.totalorder %s1406_s6, 0 }
   0xa   : > { %p201_p3 = scmp.eq.s32.totalorder %s946_s30, 1  ;;  %p947_p5 = scmp.ge.s32.totalorder %s1334_s29, 1 }
   0xb   : > { %p1415_p4 = por %p1690_p1, %p45_p0  ;;  %p208_p7 = scmp.lt.s32.totalorder %s1334_s29, 3 }
   0xc   : > { %p1420_p6 = por %p201_p3, %p45_p0  ;;  %s1336_s11 = smov [#allocation6]  }
   0xd   : > { %s1693_s8 = scalar_select %p1415_p4, 1, 0 }
   0xe   : > { %s1694_s9 = scalar_select %p1420_p6, 1, 0 }
   0xf   : > { %p1425_p8 = pnand %p947_p5, %p208_p7  ;;  %s220_s12 = sshll.u32 %s1336_s11, 4  ;;  %s1429_s12 = int_to_ptr.vmem [resolvable:$true] %s220_s12 }
  0x10   : > { %s1337_s14 = smov [#allocation8]   ;;  %s1178_s18 = scalar_lea.hbm %s1683_s1, 1024 }
  0x11   : > { %p1097_p9 = pneg %p1425_p8  ;;  %s236_s15 = sshll.u32 %s1337_s14, 4  ;;  %s1440_s15 = int_to_ptr.vmem [resolvable:$true] %s236_s15 }
  0x12   : > { %p1179_p12 = scmp.ne.s32.totalorder %s1683_s1, %s1178_s18  ;;  %p1185_p5 = scmp.lt.u32.totalorder %s1178_s18, %s1683_s1 }
  0x13   : > { %p1436_p11 = pnand %p1097_p9, %p1690_p1 }
  0x15   : > { %p1180_p13 = pneg %p1436_p11 }
  0x17   : > { %p1181_p0 = pnand %p1180_p13, %p1179_p12 }
  0x19   : > { %p1182_p3 = pneg %p1181_p0 }
  0x1b   : > { %p1187_p7 = pnand %p1185_p5, %p1182_p3 }
  0x1d   : > { %1190 = shalt.err (!%p1187_p7)
}
  0x1e   : > { %s1191_s23 = scalar_lea.vmem %s1429_s12, 1024  ;;  %p1199_p2 = scmp.lt.s32.totalorder %s1429_s12, %s1429_s12 }
  0x1f   : > { %p1192_p9 = scmp.ne.s32.totalorder %s1429_s12, %s1191_s23  ;;  %p1200_p12 = scmp.lt.s32.totalorder %s1191_s23, %s1191_s23 }
  0x21   : > { %p1194_p10 = pnand %p1192_p9, %p1180_p13  ;;  %p1201_p0 = por %p1200_p12, %p1199_p2 }
  0x23   : > { %p1195_p1 = pneg %p1194_p10 }
  0x25   : > { %p1202_p6 = pnand %p1201_p0, %p1195_p1 }
  0x27   : > { %1205 = shalt.err (!%p1202_p6)
}
  0x28   : > { %s1338_s24 = smov 64   ;;  %s1339_s25 = smov 4  }
  0x29   : > { %1100 = dma.hbm_to_vmem [thread:$0]  (!%p1436_p11), %s1683_s1, 1024, %s1429_s12, [#allocation7], %s1338_s24, %s1338_s24, %s1339_s25  }
  0x2a   : > { %s1206_s17 = scalar_lea.hbm %s1685_s3, 1024 }
  0x2b   : > { %p1207_p1 = scmp.ne.s32.totalorder %s1685_s3, %s1206_s17  ;;  %p1213_p10 = scmp.lt.u32.totalorder %s1206_s17, %s1685_s3 }
  0x2d   : > { %p1209_p2 = pnand %p1207_p1, %p1180_p13 }
  0x2f   : > { %p1210_p6 = pneg %p1209_p2 }
  0x31   : > { %p1215_p3 = pnand %p1213_p10, %p1210_p6 }
  0x33   : > { %1218 = shalt.err (!%p1215_p3)
}
  0x34   : > { %s1219_s12 = scalar_lea.vmem %s1440_s15, 1024  ;;  %p1227_p12 = scmp.lt.s32.totalorder %s1440_s15, %s1440_s15 }
  0x35   : > { %p1220_p5 = scmp.ne.s32.totalorder %s1440_s15, %s1219_s12  ;;  %p1228_p0 = scmp.lt.s32.totalorder %s1219_s12, %s1219_s12 }
  0x37   : > { %p1222_p7 = pnand %p1220_p5, %p1180_p13  ;;  %p1229_p1 = por %p1228_p0, %p1227_p12 }
  0x39   : > { %p1223_p9 = pneg %p1222_p7 }
  0x3b   : > { %p1230_p2 = pnand %p1229_p1, %p1223_p9 }
  0x3d   : > { %1233 = shalt.err (!%p1230_p2)
}
  0x3e   : > { %1103 = dma.hbm_to_vmem [thread:$0]  (!%p1436_p11), %s1685_s3, 1024, %s1440_s15, [#allocation7], %s1338_s24, %s1338_s24, %s1339_s25  }
  0x3f   : > { %s1501_s13 = sadd.s32 1, %s1334_s29   ;;  %s32_s30 = sadd.s32 1, %s1330_s28 }
  0x40   : > { %s29_s11 = ssub.s32 %s1334_s29, %s1501_s13  ;;  %p39_p13 = scmp.ne.s32.totalorder %s1330_s28, %s1326_s27 }
  0x41   : > { %p30_p6 = scmp.eq.s32.totalorder %s29_s11, 0  ;;  %p40_p10 = scmp.eq.s32.totalorder %s1334_s29, 0 }
  0x42   : > { %p1697_p3 = scmp.eq.s32.totalorder %s1406_s6, 1  ;;  %p1114_p7 = scmp.lt.s32.totalorder %s1334_s29, 2 }
  0x43   : > { %s1517_s16 = scalar_select %p30_p6, %s1330_s28, %s32_s30  }
  0x44   : > { %p1511_p5 = por %p1697_p3, %p39_p13  ;;  %p41_p9 = por %p40_p10, %p39_p13 }
  0x45   : > { %s259_s17 = sand.u32 1, %s1330_s28   ;;  %s988_s15 = sshll.u32 %s1334_s29, 10 }
  0x46   : > { %s1698_s14 = scalar_select %p1511_p5, 1, 0 }
  0x47   : > { %s951_s18 = sshll.u32 %s259_s17, 6  ;;  %s1524_s21 = scalar_lea.hbm %s1682_s0, %s988_s15 }
  0x48   : > { %s263_s12 = scalar_lea.vmem [#allocation3], %s951_s18  ;;  %p1528_p11 = pnand %p1114_p7, %p41_p9 }
  0x49   : > { %s270_s22 = sshll.u32 %s263_s12, 4  ;;  %s1532_s30 = scalar_lea.sflag [#allocation4], %s259_s17  ;;  %s1526_s22 = int_to_ptr.vmem [resolvable:$true] %s270_s22 }
  0x4a   : > { %s1234_s11 = scalar_lea.hbm %s1524_s21, 1024  ;;  %p1236_p0 = pneg %p1528_p11 }
  0x4b   : > { %p1235_p12 = scmp.ne.s32.totalorder %s1524_s21, %s1234_s11  ;;  %s1239_s19 = scalar_lea.hbm %s1682_s0, 2048 }
  0x4c   : > { %p1240_p13 = scmp.lt.u32.totalorder %s1524_s21, %s1682_s0  ;;  %p1241_p6 = scmp.lt.u32.totalorder %s1239_s19, %s1234_s11 }
  0x4d   : > { %p1237_p1 = pnand %p1236_p0, %p1235_p12  ;;  %p1243_p3 = scmp.lt.u32.totalorder %s1234_s11, %s1524_s21 }
  0x4e   : > { %p1242_p10 = por %p1241_p6, %p1240_p13 }
  0x4f   : > { %p1238_p2 = pneg %p1237_p1 }
  0x50   : > { %p1244_p7 = por %p1243_p3, %p1242_p10 }
  0x52   : > { %p1245_p9 = pnand %p1244_p7, %p1238_p2 }
  0x54   : > { %1248 = shalt.err (!%p1245_p9)
}
  0x55   : > { %s1249_s17 = scalar_lea.vmem %s1526_s22, 1024  ;;  %s1340_s18 = smov [#allocation3]  }
  0x56   : > { %p1250_p12 = scmp.ne.s32.totalorder %s1526_s22, %s1249_s17  ;;  %s1254_s15 = sshll.u32 %s1340_s18, 4  ;;  %s1255_s15 = int_to_ptr.vmem [resolvable:$false] %s1254_s15 }
  0x57   : > { %s1256_s20 = scalar_lea.vmem %s1255_s15, 2048  ;;  %p1257_p4 = scmp.lt.s32.totalorder %s1526_s22, %s1255_s15 }
  0x58   : > { %p1252_p1 = pnand %p1250_p12, %p1236_p0  ;;  %p1258_p13 = scmp.lt.s32.totalorder %s1256_s20, %s1249_s17 }
  0x5a   : > { %p1253_p5 = pneg %p1252_p1  ;;  %p1259_p6 = por %p1258_p13, %p1257_p4 }
  0x5c   : > { %p1260_p10 = pnand %p1259_p6, %p1253_p5 }
  0x5e   : > { %1263 = shalt.err (!%p1260_p10)
}
  0x5f   : > { %1107 = dma.hbm_to_vmem [thread:$0]  (!%p1528_p11), %s1524_s21, 1024, %s1526_s22, %s1532_s30, %s1338_s24, %s1338_s24, %s1339_s25  }
  0x60   : > { %282 = sbr.rel (%p1425_p8) target bundleno = 800 (0x320), region = 48  ;;  %s1566_s11 = sand.u32 (!%p1425_p8), 1, %s1326_s27  }
  0x61   : > { %s955_s19 = sshll.u32 (!%p1425_p8), %s1566_s11, 6  ;;  %s285_s12 = scalar_lea.sflag (!%p1425_p8), [#allocation4], %s1566_s11 }
  0x62   : > { %s1570_s17 = scalar_lea.vmem (!%p1425_p8), [#allocation3], %s955_s19  ;;  %p1700_p4 = scmp.ne.s32.totalorder (!%p1425_p8), %s1693_s8, 0 }
  0x67   : > { %1309 = dma.done.wait (%p1700_p4), %s285_s12, 1024  }
  0x68   : > { %1311 = vsyncadd (%p1700_p4), %s285_s12, 4294966272  ;;  %p1701_p5 = scmp.eq.s32.totalorder %s1406_s6, 0 }
  0x6a   : > { %1313 = dma.done.wait (%p1701_p5), [#allocation7], 2048   ;;  %p1702_p8 = pmov %p1701_p5 }
  0x6b   : > { %v1154_v0 = vld [vmem:[#allocation6] sm:$0xff]   ;;  %v1155_v1 = vld [vmem:[#allocation6 + $0x8] sm:$0xff]   ;;  %v1156_v2 = vld [vmem:[#allocation6 + $0x10] sm:$0xff]   ;;  %s844_s23 = sld [smem:[#allocation2]]  ;;  %s985_s30 = sshll.u32 %s1406_s6, 4 }
  0x6c   : > { %1315 = vsyncadd (%p1702_p8), [#allocation7], 4294965248  ;;  %1021 = vmatprep.subr.bf16.mxu0 %v1154_v0  ;;  %v1157_v3 = vld [vmem:[#allocation6 + $0x18] sm:$0xff]   ;;  %v1162_v4 = vld [vmem:[%s1570_s17] sm:$0xff]   ;;  %s325_s18 = scalar_lea.vmem [#allocation9], %s1566_s11  ;;  %s1638_s12 = scalar_lea.hbm %s1689_s7, %s985_s30 }
  0x6d   : > { %1022 = vmatpush3.bf16.msra.mxu0 %v1154_v0  ;;  %1037 = vmatprep.mubr.bf16.mxu0 %v1162_v4  ;;  %v1158_v5 = vld [vmem:[#allocation6 + $0x20] sm:$0xff]   ;;  %v1159_v6 = vld [vmem:[#allocation6 + $0x28] sm:$0xff]   ;;  %v1160_v9 = vld [vmem:[#allocation6 + $0x30] sm:$0xff]   ;;  %s861_s15 = sshll.u32 %s325_s18, 4  ;;  %p1703_p0 = scmp.ne.s32.totalorder %s1698_s14, 0  ;;  %s1640_s15 = int_to_ptr.vmem [resolvable:$true] %s861_s15 }
  0x6e   : > { %1023 = vmatprep.subr.bf16.mxu0 %v1155_v1  ;;  %v1170_v7 = vld [vmem:[#allocation8] sm:$0xff]   ;;  %v1171_v8 = vld [vmem:[#allocation8 + $0x8] sm:$0xff]   ;;  %v1172_v10 = vld [vmem:[#allocation8 + $0x10] sm:$0xff]   ;;  %s1264_s8 = scalar_lea.vmem %s1640_s15, 16  ;;  %s1341_s6 = smov [#allocation9]  }
  0x6f   : > { %1053 = vmatprep.subr.bf16.mxu1 %v1170_v7  ;;  %v1161_v11 = vld [vmem:[#allocation6 + $0x38] sm:$0xff]   ;;  %v1174_v13 = vld [vmem:[#allocation8 + $0x20] sm:$0xff]   ;;  %v1163_v14 = vld [vmem:[%s1570_s17 + $0x8] sm:$0xff]   ;;  %p1265_p11 = scmp.ne.s32.totalorder %s1640_s15, %s1264_s8  ;;  %s1268_s10 = sshll.u32 %s1341_s6, 4  ;;  %s1269_s10 = int_to_ptr.vmem [resolvable:$false] %s1268_s10 }
  0x70   : > { %1054 = vmatpush3.bf16.msra.mxu1 %v1170_v7  ;;  %v1173_v12 = vld [vmem:[#allocation8 + $0x18] sm:$0xff]   ;;  %v1164_v15 = vld [vmem:[%s1570_s17 + $0x10] sm:$0xff]   ;;  %v1175_v16 = vld [vmem:[#allocation8 + $0x28] sm:$0xff]   ;;  %s1270_s24 = scalar_lea.vmem %s1269_s10, 32  ;;  %p1271_p7 = scmp.lt.s32.totalorder %s1640_s15, %s1269_s10 }
  0x71   : > { %1024 = vmatpush3.bf16.msra.mxu0 %v1155_v1  ;;  %1055 = vmatprep.subr.bf16.mxu1 %v1171_v8  ;;  %v1165_v17 = vld [vmem:[%s1570_s17 + $0x18] sm:$0xff]   ;;  %v1166_v18 = vld [vmem:[%s1570_s17 + $0x20] sm:$0xff]   ;;  %v1167_v19 = vld [vmem:[%s1570_s17 + $0x28] sm:$0xff]   ;;  %p1266_p2 = pnand %p1265_p11, %p1703_p0  ;;  %p1272_p9 = scmp.lt.s32.totalorder %s1270_s24, %s1264_s8 }
  0x72   : > { %1025 = vmatprep.subr.bf16.mxu0 %v1156_v2  ;;  %v1168_v20 = vld [vmem:[%s1570_s17 + $0x30] sm:$0xff]   ;;  %v1169_v21 = vld [vmem:[%s1570_s17 + $0x38] sm:$0xff]   ;;  %v958_v24 = vld [vmem:[%s1684_s2] ss:$0 sm:$0xff]  ;;  %s849_s17 = scalar_lea.sflag [#allocation5], %s1566_s11 }
  0x73   : > { %v1176_v22 = vld [vmem:[#allocation8 + $0x30] sm:$0xff]   ;;  %v1177_v23 = vld [vmem:[#allocation8 + $0x38] sm:$0xff]   ;;  %p1267_p3 = pneg %p1266_p2  ;;  %p1273_p12 = por %p1272_p9, %p1271_p7 }
  0x74   : > { %1056 = vmatpush3.bf16.msra.mxu1 %v1171_v8 }
  0x75   : > { %1026 = vmatpush3.bf16.msra.mxu0 %v1156_v2  ;;  %1057 = vmatprep.subr.bf16.mxu1 %v1172_v10  ;;  %p1274_p1 = pnand %p1273_p12, %p1267_p3 }
  0x76   : > { %1027 = vmatprep.subr.bf16.mxu0 %v1157_v3 }
  0x78   : > { %1058 = vmatpush3.bf16.msra.mxu1 %v1172_v10 }
  0x79   : > { %1028 = vmatpush3.bf16.msra.mxu0 %v1157_v3  ;;  %1059 = vmatprep.subr.bf16.mxu1 %v1173_v12 }
  0x7a   : > { %1029 = vmatprep.subr.bf16.mxu0 %v1158_v5 }
  0x7c   : > { %1060 = vmatpush3.bf16.msra.mxu1 %v1173_v12 }
  0x7d   : > { %1030 = vmatpush3.bf16.msra.mxu0 %v1158_v5  ;;  %1061 = vmatprep.subr.bf16.mxu1 %v1174_v13 }
  0x7e   : > { %1031 = vmatprep.subr.bf16.mxu0 %v1159_v6 }
  0x80   : > { %1062 = vmatpush3.bf16.msra.mxu1 %v1174_v13 }
  0x81   : > { %1032 = vmatpush3.bf16.msra.mxu0 %v1159_v6  ;;  %1063 = vmatprep.subr.bf16.mxu1 %v1175_v16 }
  0x82   : > { %1033 = vmatprep.subr.bf16.mxu0 %v1160_v9 }
  0x84   : > { %1064 = vmatpush3.bf16.msra.mxu1 %v1175_v16 }
  0x85   : > { %1034 = vmatpush3.bf16.msra.mxu0 %v1160_v9  ;;  %1065 = vmatprep.subr.bf16.mxu1 %v1176_v22 }
  0x86   : > { %1035 = vmatprep.subr.bf16.mxu0 %v1161_v11 }
  0x88   : > { %1066 = vmatpush3.bf16.msra.mxu1 %v1176_v22 }
  0x89   : > { %1036 = vmatpush3.bf16.msra.mxu0 %v1161_v11  ;;  %1067 = vmatprep.subr.bf16.mxu1 %v1177_v23 }
  0x8c   : > { %1038 = vmatmul.mubr.bf16.vlgmr.msra.gmra.mrb[0].mxu0 %v1163_v14  ;;  %1068 = vmatpush3.bf16.msra.mxu1 %v1177_v23  ;;  %v1600_v23 = vld [vmem:[%s1687_s5] ss:$0 sm:$0xff] }
  0x8d   : > { %1041 = vmatprep.mubr.bf16.mxu0 %v1164_v15 }
  0x94   : > { %1042 = vmatmul.mubr.bf16.gmra.mrb[4].mxu0 %v1165_v17  ;;  %v1594_v17 = vld [vmem:[%s1686_s4] ss:$0 sm:$0xff] }
  0x95   : > { %1045 = vmatprep.mubr.bf16.mxu0 %v1166_v18 }
  0x9c   : > { %1046 = vmatmul.mubr.bf16.gmra.mrb[8].mxu0 %v1167_v19 }
  0x9d   : > { %1049 = vmatprep.mubr.bf16.mxu0 %v1168_v20 }
  0xa4   : > { %1050 = vmatmul.mubr.bf16.gmra.mrb[12].mxu0 %v1169_v21 }
 0x15f   : > { %v1039_v25 = vpop.f32.mrb[0].mxu0 }
 0x160   : > { %v506_v26 = vadd.f32 %v1039_v25, %v958_v24  ;;  %v497_v27 = vpop.f32.mrb[1].mxu0 }
 0x161   : > { %v498_v28 = vadd.f32 %v958_v24, %v497_v27  ;;  %v1040_v29 = vpop.f32.mrb[2].mxu0 }
 0x162   : > { %v509_v30 = vadd.f32 %v1040_v29, %v958_v24  ;;  %v500_v31 = vpop.f32.mrb[3].mxu0  ;;  %v562_v33 = vmax.f32 %v506_v26, 0.0 }
 0x163   : > { %v501_v32 = vadd.f32 %v958_v24, %v500_v31  ;;  %v560_v35 = vmax.f32 %v498_v28, 0.0 }
 0x164   : > { %v563_v34 = vmax.f32 %v509_v30, 0.0 }
 0x165   : > { %v561_v36 = vmax.f32 %v501_v32, 0.0 }
 0x166   : > { %v577_v37 = vpack.c.bf16 %v563_v34, %v562_v33 }
 0x167   : > { %v1043_v38 = vpop.f32.mrb[4].mxu0  ;;  %v576_v39 = vpack.c.bf16 %v561_v36, %v560_v35 }
 0x168   : > { %v522_v40 = vadd.f32 %v1043_v38, %v958_v24  ;;  %v513_v41 = vpop.f32.mrb[5].mxu0 }
 0x169   : > { %v514_v42 = vadd.f32 %v958_v24, %v513_v41  ;;  %1069 = vmatprep.mubr.bf16.mxu1 %v576_v39  ;;  %v1044_v43 = vpop.f32.mrb[6].mxu0 }
 0x16a   : > { %v566_v44 = vmax.f32 %v522_v40, 0.0  ;;  %v525_v45 = vadd.f32 %v1044_v43, %v958_v24  ;;  %1070 = vmatmul.mubr.bf16.vlgmr.msra.gmra.mrb[0].mxu1 %v577_v37  ;;  %v516_v46 = vpop.f32.mrb[7].mxu0 }
 0x16b   : > { %v564_v47 = vmax.f32 %v514_v42, 0.0  ;;  %v517_v48 = vadd.f32 %v958_v24, %v516_v46 }
 0x16c   : > { %v567_v49 = vmax.f32 %v525_v45, 0.0 }
 0x16d   : > { %v565_v50 = vmax.f32 %v517_v48, 0.0 }
 0x16e   : > { %v579_v51 = vpack.c.bf16 %v567_v49, %v566_v44 }
 0x16f   : > { %v578_v52 = vpack.c.bf16 %v565_v50, %v564_v47  ;;  %v1047_v53 = vpop.f32.mrb[8].mxu0 }
 0x170   : > { %v538_v54 = vadd.f32 %v1047_v53, %v958_v24  ;;  %v529_v55 = vpop.f32.mrb[9].mxu0 }
 0x171   : > { %1073 = vmatprep.mubr.bf16.mxu1 %v578_v52  ;;  %v530_v56 = vadd.f32 %v958_v24, %v529_v55  ;;  %v1048_v57 = vpop.f32.mrb[10].mxu0 }
 0x172   : > { %1074 = vmatmul.mubr.bf16.gmra.mrb[4].mxu1 %v579_v51  ;;  %v570_v58 = vmax.f32 %v538_v54, 0.0  ;;  %v541_v59 = vadd.f32 %v1048_v57, %v958_v24  ;;  %v532_v60 = vpop.f32.mrb[11].mxu0 }
 0x173   : > { %v568_v61 = vmax.f32 %v530_v56, 0.0  ;;  %v533_v62 = vadd.f32 %v958_v24, %v532_v60 }
 0x174   : > { %v571_v63 = vmax.f32 %v541_v59, 0.0 }
 0x175   : > { %v569_v0 = vmax.f32 %v533_v62, 0.0 }
 0x176   : > { %v581_v1 = vpack.c.bf16 %v571_v63, %v570_v58 }
 0x177   : > { %v580_v2 = vpack.c.bf16 %v569_v0, %v568_v61  ;;  %v1051_v3 = vpop.f32.mrb[12].mxu0 }
 0x178   : > { %v554_v4 = vadd.f32 %v1051_v3, %v958_v24  ;;  %v545_v5 = vpop.f32.mrb[13].mxu0 }
 0x179   : > { %1077 = vmatprep.mubr.bf16.mxu1 %v580_v2  ;;  %v546_v6 = vadd.f32 %v958_v24, %v545_v5  ;;  %v1052_v7 = vpop.f32.mrb[14].mxu0 }
 0x17a   : > { %1078 = vmatmul.mubr.bf16.gmra.mrb[8].mxu1 %v581_v1  ;;  %v574_v8 = vmax.f32 %v554_v4, 0.0  ;;  %v557_v9 = vadd.f32 %v1052_v7, %v958_v24  ;;  %v548_v10 = vpop.f32.mrb[15].mxu0 }
 0x17b   : > { %v572_v11 = vmax.f32 %v546_v6, 0.0  ;;  %v549_v12 = vadd.f32 %v958_v24, %v548_v10 }
 0x17c   : > { %v575_v13 = vmax.f32 %v557_v9, 0.0 }
 0x17d   : > { %v573_v14 = vmax.f32 %v549_v12, 0.0 }
 0x17e   : > { %v583_v15 = vpack.c.bf16 %v575_v13, %v574_v8 }
 0x17f   : > { %v582_v16 = vpack.c.bf16 %v573_v14, %v572_v11 }
 0x181   : > { %1081 = vmatprep.mubr.bf16.mxu1 %v582_v16 }
 0x182   : > { %1082 = vmatmul.mubr.bf16.gmra.mrb[12].mxu1 %v583_v15 }
 0x23d   : > { %v1071_v18 = vpop.f32.mrb[0].mxu1 }
 0x23e   : > { %v689_v19 = vpop.f32.mrb[1].mxu1  ;;  %v698_v26 = vadd.f32 %v1071_v18, %v1594_v17 }
 0x23f   : > { %v690_v20 = vadd.f32 %v1594_v17, %v689_v19  ;;  %v1072_v21 = vpop.f32.mrb[2].mxu1 }
 0x240   : > { %v692_v22 = vpop.f32.mrb[3].mxu1  ;;  %v754_v31 = vmax.f32 %v698_v26, 0.0  ;;  %v701_v32 = vadd.f32 %v1072_v21, %v1594_v17 }
 0x241   : > { %v752_v24 = vmax.f32 %v690_v20, 0.0  ;;  %v693_v25 = vadd.f32 %v1594_v17, %v692_v22 }
 0x242   : > { %v755_v36 = vmax.f32 %v701_v32, 0.0  ;;  %v777_v38 = vmul.f32 %v1600_v23, %v754_v31 }
 0x243   : > { %v753_v27 = vmax.f32 %v693_v25, 0.0  ;;  %v775_v28 = vmul.f32 %v1600_v23, %v752_v24 }
 0x244   : > { %v778_v43 = vmul.f32 %v1600_v23, %v755_v36 }
 0x245   : > { %791 = vxpose.xlu0.b32.start [1/16] %v775_v28, 128  ;;  %v1075_v29 = vpop.f32.mrb[4].mxu1  ;;  %v776_v34 = vmul.f32 %v1600_v23, %v753_v27 }
 0x246   : > { %v705_v30 = vpop.f32.mrb[5].mxu1  ;;  %v714_v46 = vadd.f32 %v1075_v29, %v1594_v17 }
 0x247   : > { %v1076_v33 = vpop.f32.mrb[6].mxu1  ;;  %v706_v37 = vadd.f32 %v1594_v17, %v705_v30 }
 0x248   : > { %v708_v35 = vpop.f32.mrb[7].mxu1  ;;  %v758_v51 = vmax.f32 %v714_v46, 0.0  ;;  %v717_v52 = vadd.f32 %v1076_v33, %v1594_v17 }
 0x249   : > { %792 = vxpose.xlu0.b32.cont [2/16] %v776_v34, 128  ;;  %v756_v41 = vmax.f32 %v706_v37, 0.0  ;;  %v709_v42 = vadd.f32 %v1594_v17, %v708_v35 }
 0x24a   : > { %v759_v56 = vmax.f32 %v717_v52, 0.0  ;;  %v781_v58 = vmul.f32 %v1600_v23, %v758_v51 }
 0x24b   : > { %v757_v47 = vmax.f32 %v709_v42, 0.0  ;;  %v779_v48 = vmul.f32 %v1600_v23, %v756_v41 }
 0x24c   : > { %v782_v61 = vmul.f32 %v1600_v23, %v759_v56 }
 0x24d   : > { %793 = vxpose.xlu0.b32.cont [3/16] %v777_v38, 128  ;;  %v1079_v39 = vpop.f32.mrb[8].mxu1  ;;  %v780_v53 = vmul.f32 %v1600_v23, %v757_v47 }
 0x24e   : > { %v721_v40 = vpop.f32.mrb[9].mxu1  ;;  %v730_v62 = vadd.f32 %v1079_v39, %v1594_v17 }
 0x24f   : > { %v1080_v44 = vpop.f32.mrb[10].mxu1  ;;  %v722_v57 = vadd.f32 %v1594_v17, %v721_v40 }
 0x250   : > { %v724_v45 = vpop.f32.mrb[11].mxu1  ;;  %v762_v1 = vmax.f32 %v730_v62, 0.0  ;;  %v733_v2 = vadd.f32 %v1080_v44, %v1594_v17 }
 0x251   : > { %794 = vxpose.xlu0.b32.cont [4/16] %v778_v43, 128  ;;  %v760_v59 = vmax.f32 %v722_v57, 0.0  ;;  %v725_v60 = vadd.f32 %v1594_v17, %v724_v45 }
 0x252   : > { %v763_v4 = vmax.f32 %v733_v2, 0.0  ;;  %v785_v6 = vmul.f32 %v1600_v23, %v762_v1 }
 0x253   : > { %v761_v63 = vmax.f32 %v725_v60, 0.0  ;;  %v783_v0 = vmul.f32 %v1600_v23, %v760_v59 }
 0x254   : > { %v786_v9 = vmul.f32 %v1600_v23, %v763_v4 }
 0x255   : > { %795 = vxpose.xlu0.b32.cont [5/16] %v779_v48, 128  ;;  %v1083_v49 = vpop.f32.mrb[12].mxu1  ;;  %v784_v3 = vmul.f32 %v1600_v23, %v761_v63 }
 0x256   : > { %v737_v50 = vpop.f32.mrb[13].mxu1  ;;  %v746_v10 = vadd.f32 %v1083_v49, %v1594_v17 }
 0x257   : > { %v1084_v54 = vpop.f32.mrb[14].mxu1  ;;  %v738_v5 = vadd.f32 %v1594_v17, %v737_v50 }
 0x258   : > { %v740_v55 = vpop.f32.mrb[15].mxu1  ;;  %v766_v13 = vmax.f32 %v746_v10, 0.0  ;;  %v749_v14 = vadd.f32 %v1084_v54, %v1594_v17 }
 0x259   : > { %796 = vxpose.xlu0.b32.cont [6/16] %v780_v53, 128  ;;  %v764_v7 = vmax.f32 %v738_v5, 0.0  ;;  %v741_v8 = vadd.f32 %v1594_v17, %v740_v55  ;;  %v845_v55 = vstv %s844_s23 }
 0x25a   : > { %v767_v16 = vmax.f32 %v749_v14, 0.0  ;;  %v789_v18 = vmul.f32 %v1600_v23, %v766_v13 }
 0x25b   : > { %v765_v11 = vmax.f32 %v741_v8, 0.0  ;;  %v787_v12 = vmul.f32 %v1600_v23, %v764_v7 }
 0x25c   : > { %v790_v19 = vmul.f32 %v1600_v23, %v767_v16 }
 0x25d   : > { %797 = vxpose.xlu0.b32.cont [7/16] %v781_v58, 128  ;;  %v788_v15 = vmul.f32 %v1600_v23, %v765_v11 }
 0x261   : > { %798 = vxpose.xlu0.b32.cont [8/16] %v782_v61, 128 }
 0x265   : > { %799 = vxpose.xlu0.b32.cont [9/16] %v783_v0, 128 }
 0x269   : > { %800 = vxpose.xlu0.b32.cont [10/16] %v784_v3, 128 }
 0x26d   : > { %801 = vxpose.xlu0.b32.cont [11/16] %v785_v6, 128 }
 0x271   : > { %802 = vxpose.xlu0.b32.cont [12/16] %v786_v9, 128 }
 0x275   : > { %803 = vxpose.xlu0.b32.cont [13/16] %v787_v12, 128 }
 0x279   : > { %804 = vxpose.xlu0.b32.cont [14/16] %v788_v15, 128 }
 0x27d   : > { %805 = vxpose.xlu0.b32.cont [15/16] %v789_v18, 128 }
 0x281   : > { %806 = vxpose.xlu0.b32.end [16/16] %v790_v19, 128 }
 0x2c5   : > { %v807_v20 = vpop.trf.xlu0 }
 0x2c9   : > { %v808_v21 = vpop.trf.xlu0 }
 0x2ca   : > { %v823_v17 = vadd.f32 %v808_v21, %v807_v20 }
 0x2cd   : > { %v809_v22 = vpop.trf.xlu0 }
 0x2ce   : > { %v824_v30 = vadd.f32 %v823_v17, %v809_v22 }
 0x2d1   : > { %v810_v24 = vpop.trf.xlu0 }
 0x2d2   : > { %v825_v32 = vadd.f32 %v824_v30, %v810_v24 }
 0x2d5   : > { %v811_v25 = vpop.trf.xlu0 }
 0x2d6   : > { %v826_v33 = vadd.f32 %v825_v32, %v811_v25 }
 0x2d9   : > { %v812_v26 = vpop.trf.xlu0 }
 0x2da   : > { %v827_v35 = vadd.f32 %v826_v33, %v812_v26 }
 0x2dd   : > { %v813_v27 = vpop.trf.xlu0 }
 0x2de   : > { %v828_v36 = vadd.f32 %v827_v35, %v813_v27 }
 0x2e1   : > { %v814_v28 = vpop.trf.xlu0 }
 0x2e2   : > { %v829_v23 = vadd.f32 %v828_v36, %v814_v28 }
 0x2e5   : > { %v815_v29 = vpop.trf.xlu0 }
 0x2e6   : > { %v830_v38 = vadd.f32 %v829_v23, %v815_v29 }
 0x2e9   : > { %v816_v31 = vpop.trf.xlu0 }
 0x2ea   : > { %v831_v40 = vadd.f32 %v830_v38, %v816_v31 }
 0x2ed   : > { %v817_v34 = vpop.trf.xlu0 }
 0x2ee   : > { %v832_v41 = vadd.f32 %v831_v40, %v817_v34 }
 0x2f1   : > { %v818_v37 = vpop.trf.xlu0 }
 0x2f2   : > { %v833_v43 = vadd.f32 %v832_v41, %v818_v37 }
 0x2f5   : > { %v819_v39 = vpop.trf.xlu0 }
 0x2f6   : > { %v834_v44 = vadd.f32 %v833_v43, %v819_v39 }
 0x2f9   : > { %v820_v42 = vpop.trf.xlu0 }
 0x2fa   : > { %v835_v46 = vadd.f32 %v834_v44, %v820_v42 }
 0x2fd   : > { %v821_v45 = vpop.trf.xlu0 }
 0x2fe   : > { %v836_v47 = vadd.f32 %v835_v46, %v821_v45 }
 0x301   : > { %v822_v48 = vpop.trf.xlu0 }
 0x302   : > { %v837_v49 = vadd.f32 %v836_v47, %v822_v48 }
 0x304   : > { %v838_v50 = vrot.slane %v837_v49, 4 }
 0x306   : > { %v839_v51 = vadd.f32 %v838_v50, %v837_v49 }
 0x308   : > { %v840_v52 = vrot.slane %v839_v51, 2 }
 0x30a   : > { %v841_v53 = vadd.f32 %v840_v52, %v839_v51 }
 0x30c   : > { %v842_v54 = vrot.slane %v841_v53, 1 }
 0x30e   : > { %v843_v56 = vadd.f32 %v842_v54, %v841_v53 }
 0x310   : > { %v846_v57 = vadd.f32 %v845_v55, %v843_v56 }
 0x312   : > { %847 = vst [vmem:[%s325_s18] sm:$0x1] %v846_v57 }
 0x313   : > { %1277 = shalt.err (!%p1274_p1)
}
 0x314   : > { %s1278_s11 = scalar_lea.hbm %s1638_s12, 16  ;;  %s1282_s22 = scalar_lea.hbm %s1689_s7, 32 }
 0x315   : > { %p1279_p13 = scmp.ne.s32.totalorder %s1638_s12, %s1278_s11  ;;  %p1283_p4 = scmp.lt.u32.totalorder %s1638_s12, %s1689_s7 }
 0x316   : > { %p1284_p5 = scmp.lt.u32.totalorder %s1282_s22, %s1278_s11  ;;  %p1286_p11 = scmp.lt.u32.totalorder %s1278_s11, %s1638_s12 }
 0x317   : > { %p1280_p6 = pnand %p1279_p13, %p1703_p0 }
 0x318   : > { %p1285_p8 = por %p1284_p5, %p1283_p4 }
 0x319   : > { %p1281_p10 = pneg %p1280_p6 }
 0x31a   : > { %p1287_p2 = por %p1286_p11, %p1285_p8 }
 0x31c   : > { %p1288_p3 = pnand %p1287_p2, %p1281_p10 }
 0x31e   : > { %1291 = shalt.err (!%p1288_p3)
}
 0x31f   : > { %1095 = dma.vmem_to_hbm [thread:$0]  (%p1703_p0), %s1640_s15, 16, %s1638_s12, %s849_s17  }
 0x320 PF: > { %s873_s18 = sand.u32 1, %s1322_s26   ;;  %p1704_p7 = scmp.ne.s32.totalorder %s1694_s9, 0 }
 0x321   : > { %p1705_p9 = scmp.ge.s32.totalorder %s1334_s29, 2  ;;  %s874_s20 = scalar_lea.sflag [#allocation5], %s873_s18 }
 0x323   : > { %p1109_p12 = pnand %p1705_p9, %p1704_p7 }
 0x325   : > { %1317 = dma.done.wait (!%p1109_p12), %s874_s20, 16  }
 0x326   : > { %1319 = vsyncadd (!%p1109_p12), %s874_s20, 4294967280  ;;  %p22_p1 = scmp.ge.s32.totalorder %s1501_s13, 4   ;;  %s1706_s26 = smov %s1326_s27 }
 0x327   : > { %s1707_s27 = smov %s1330_s28  ;;  %s1708_s28 = smov %s1517_s16 }
 0x328   : > { %s1709_s29 = smov %s1501_s13  ;;  %24 = sbr.rel (!%p22_p1) target bundleno = 8 (0x8), region = 101 }
 0x32f   :  { %878 = vsyncpa [#allocation4], 1 }
 0x330   :  { %880 = vsyncpa [#allocation4 + $0x1], 1 }
 0x331   :  { %881 = vsyncpa [#allocation7], 1 }
 0x332   :  { %882 = vsyncpa [#allocation5], 1 }
 0x333   :  { %884 = vsyncpa [#allocation5 + $0x1], 1 }

</bundles_post_ra>
